<compile_context>
chip_gen: v5e
topology: v5e:2x2
jax: 0.10.0
libtpu: 0.0.40
codegen_flags: <defaults>
</compile_context>

<pallas_src>
import functools

import jax
import jax.numpy as jnp
from jax.experimental import pallas as pl
from jax.experimental.pallas import tpu as pltpu

# ---- physical constants from the module ----
H_CONST = 6.62607015e-34
KB_CONST = 1.380649e-23
J_TO_KCAL = 4184.0
R_CONST = 8.31
TEMPERATURE = 273.0 + 80.0
S_TO_H = 3.6
ARR_PREFACTOR = KB_CONST * TEMPERATURE / H_CONST / S_TO_H
ARR_EXP_SCALE = J_TO_KCAL / R_CONST / TEMPERATURE

LEAKY_SLOPE = 0.01  # nn.LeakyReLU() default negative_slope

LANE = 128


def _leaky_relu(x):
    return jnp.where(x > 0, x, LEAKY_SLOPE * x)


def _round_up(n, m):
    return ((n + m - 1) // m) * m


# --------------------------------------------------------------------------
# Kernel: three small MXU dots (r@Wr + l@Wl fused layer-1, then layer-2) plus
# an f32 elementwise tail.  Weights are grid-invariant VMEM-resident blocks.
# --------------------------------------------------------------------------
def _fused_dnn_kernel(r_ref, l_ref, wr_ref, wl_ref, ba_ref, wo_ref, bo_ref, out_ref):
    # r:  [TB, Dr]      reactant rows (tiled over batch)
    # l:  [TB, Dl]      ligand rows
    # wr: [Dr, Dp]      top rows of block-diag fused first-layer weight
    # wl: [Dl, Dp]      bottom rows (w1 lower block | w2)
    # ba: [1, Dp]       fused first-layer bias (f32)
    # wo: [Dp, Do]      output-layer weight (padded rows are zero)
    # bo: [1, Do]       output-layer bias (f32)
    cdt = wr_ref.dtype
    r = r_ref[...].astype(cdt)
    l = l_ref[...].astype(cdt)

    # Layer 1: dense_E1 and dense_E2 fused (block-diagonal), f32 accumulation.
    h = (jnp.dot(r, wr_ref[...], preferred_element_type=jnp.float32)
         + jnp.dot(l, wl_ref[...], preferred_element_type=jnp.float32)
         + ba_ref[...])
    h = _leaky_relu(h)

    # Layer 2: dense_output.  Cast back to the MXU dtype only for the dot;
    # bias add / LeakyReLU / exp stay in f32 (required on v5e, free elsewhere).
    out = jnp.dot(h.astype(cdt), wo_ref[...], preferred_element_type=jnp.float32)
    out = _leaky_relu(out + bo_ref[...])

    # arrhenius_formula.  NOTE: rows past the real batch in a trailing partial
    # tile compute exp() on stale VMEM (never written back -> harmless).
    out_ref[...] = (ARR_PREFACTOR * jnp.exp(-out * ARR_EXP_SCALE)).astype(out_ref.dtype)


# --------------------------------------------------------------------------
# One-time parameter preparation (layout plumbing off the per-call path).
# Returns ONLY arrays so it can be passed straight into the jitted wrapper.
# --------------------------------------------------------------------------
def prepare_params(params, Dr, Dl, compute_dtype=jnp.float32):
    """Fuse + lane-pad the raw per-layer weights once.

    Raw params are stored as [in_features, out_features] (y = x @ W + b,
    i.e. W = W_torch.T for nn.Linear).
    """
    D1 = Dr + Dl          # dense_E1 units
    D2 = Dl               # dense_E2 units
    Do = D1 + D2          # dense_output units (== hidden width)
    Dp = _round_up(Do, LANE)   # padded hidden width (lane-dense intermediate)

    w1 = jnp.asarray(params["w1"], jnp.float32)   # [D1, D1]
    b1 = jnp.asarray(params["b1"], jnp.float32)   # [D1]
    w2 = jnp.asarray(params["w2"], jnp.float32)   # [D2, D2]
    b2 = jnp.asarray(params["b2"], jnp.float32)   # [D2]
    wo = jnp.asarray(params["wo"], jnp.float32)   # [Do, Do]
    bo = jnp.asarray(params["bo"], jnp.float32)   # [Do]

    # Block-diagonal fused first layer, split by input stream:
    #   [r | l] @ [[w1_top, 0], [w1_bot, w2]] == r @ wa_r + l @ wa_l
    wa_r = jnp.zeros((Dr, Dp), jnp.float32).at[:, :D1].set(w1[:Dr])
    wa_l = jnp.zeros((Dl, Dp), jnp.float32)
    wa_l = wa_l.at[:, :D1].set(w1[Dr:])
    wa_l = wa_l.at[:, D1:Do].set(w2)
    ba = jnp.zeros((1, Dp), jnp.float32)
    ba = ba.at[0, :D1].set(b1)
    ba = ba.at[0, D1:Do].set(b2)

    # Output layer: rows padded to Dp (zeros contribute nothing), columns kept
    # at Do so the kernel writes the final result directly (no wrapper slice).
    wo_p = jnp.zeros((Dp, Do), jnp.float32).at[:Do, :].set(wo)
    bo_p = bo.reshape(1, Do)

    return {
        "wa_r": wa_r.astype(compute_dtype),
        "wa_l": wa_l.astype(compute_dtype),
        "ba": ba,                          # biases stay f32 (f32 epilogue)
        "wo": wo_p.astype(compute_dtype),
        "bo": bo_p,
    }


def _pick_batch_tile(B, block_b):
    """Batch tile: multiple of 8 (or full B), capped at block_b, and split so
    there are >= 2 grid steps when B allows (v7x megacore sharding)."""
    if B <= 8:
        return B
    half = _round_up(pl.cdiv(B, 2), 8)
    return min(block_b, half)


# --------------------------------------------------------------------------
# Wrapper: batch-tiled, pipelined, parallel-over-batch pallas_call.
# --------------------------------------------------------------------------
@functools.partial(jax.jit, static_argnames=("block_b", "out_dtype"))
def custom_neural_network_forward(reactant, ligand, prepared, *,
                                  block_b=4096, out_dtype=jnp.float32):
    B, Dr = reactant.shape
    Bl, Dl = ligand.shape
    assert B == Bl

    wa_r, wa_l, ba = prepared["wa_r"], prepared["wa_l"], prepared["ba"]
    wo, bo = prepared["wo"], prepared["bo"]
    assert wa_r.shape[0] == Dr and wa_l.shape[0] == Dl
    Dp = wa_r.shape[1]
    Do = wo.shape[1]

    tb = _pick_batch_tile(B, block_b)
    grid = (pl.cdiv(B, tb),)

    in_bytes = reactant.dtype.itemsize
    cdt_bytes = jnp.dtype(wa_r.dtype).itemsize
    out_bytes = jnp.dtype(out_dtype).itemsize
    cost = pl.CostEstimate(
        flops=2 * B * (Dr * Dp + Dl * Dp + Dp * Do),
        transcendentals=B * Do,
        bytes_accessed=(B * (Dr + Dl) * in_bytes
                        + ((Dr + Dl + Dp) * Dp * cdt_bytes) + (Dp + Do) * 4
                        + B * Do * out_bytes),
    )

    return pl.pallas_call(
        _fused_dnn_kernel,
        out_shape=jax.ShapeDtypeStruct((B, Do), out_dtype),
        grid=grid,
        in_specs=[
            pl.BlockSpec((tb, Dr), lambda i: (i, 0)),        # reactant: tiled rows
            pl.BlockSpec((tb, Dl), lambda i: (i, 0)),        # ligand:   tiled rows
            pl.BlockSpec(wa_r.shape, lambda i: (0, 0)),      # weights: grid-invariant
            pl.BlockSpec(wa_l.shape, lambda i: (0, 0)),
            pl.BlockSpec(ba.shape, lambda i: (0, 0)),
            pl.BlockSpec(wo.shape, lambda i: (0, 0)),
            pl.BlockSpec(bo.shape, lambda i: (0, 0)),
        ],
        out_specs=pl.BlockSpec((tb, Do), lambda i: (i, 0)),  # final width, no wrapper slice
        compiler_params=pltpu.CompilerParams(
            dimension_semantics=("parallel",),
            vmem_limit_bytes=32 * 1024 * 1024,
        ),
        cost_estimate=cost,
    )(reactant, ligand, wa_r, wa_l, ba, wo, bo)


# --------------------------------------------------------------------------
# Synthetic params + pure-JAX reference.
# --------------------------------------------------------------------------
def init_params(key, Dr, Dl):
    """Deterministic synthetic parameters (shapes match nn.Linear(units, units))."""
    D1 = Dr + Dl
    D2 = Dl
    Do = D1 + D2
    ks = jax.random.split(key, 6)
    scale = 0.1
    return {
        "w1": scale * jax.random.normal(ks[0], (D1, D1), jnp.float32),
        "b1": scale * jax.random.normal(ks[1], (D1,), jnp.float32),
        "w2": scale * jax.random.normal(ks[2], (D2, D2), jnp.float32),
        "b2": scale * jax.random.normal(ks[3], (D2,), jnp.float32),
        "wo": scale * jax.random.normal(ks[4], (Do, Do), jnp.float32),
        "bo": scale * jax.random.normal(ks[5], (Do,), jnp.float32),
    }


def reference_forward(reactant, ligand, params):
    """Pure-JAX reference for correctness check (highest matmul precision)."""
    hp = jax.lax.Precision.HIGHEST
    x1 = jnp.concatenate([reactant, ligand], axis=1)
    e1 = _leaky_relu(jnp.dot(x1, params["w1"], precision=hp) + params["b1"])
    e2 = _leaky_relu(jnp.dot(ligand, params["w2"], precision=hp) + params["b2"])
    xo = jnp.concatenate([e1, e2], axis=1)
    out = _leaky_relu(jnp.dot(xo, params["wo"], precision=hp) + params["bo"])
    return ARR_PREFACTOR * jnp.exp(-out * ARR_EXP_SCALE)


# TODO(synk): use_vertex_value / for_analysis / return_full / return_layers_info
# branches of the torch module are host-side control flow (return raw inputs /
# layer objects); they are not part of the numeric forward and are not lowered.

if __name__ == "__main__":
    key = jax.random.PRNGKey(0)
    k_r, k_l, k_p = jax.random.split(key, 3)

    B, Dr, Dl = 2, 16, 16
    Do = Dr + 2 * Dl
    reactant = jax.random.normal(k_r, (B, Dr), jnp.float32)
    ligand = jax.random.normal(k_l, (B, Dl), jnp.float32)
    params = init_params(k_p, Dr, Dl)
    ref = reference_forward(reactant, ligand, params)

    # --- f32 weights, f32 output (tight relative check) ---
    prep_f32 = prepare_params(params, Dr, Dl, compute_dtype=jnp.float32)
    out_f32 = jax.block_until_ready(
        custom_neural_network_forward(reactant, ligand, prep_f32))
    assert out_f32.shape == (B, Do)
    assert jnp.allclose(out_f32, ref, rtol=2e-2, atol=0.0), "f32 mismatch"

    # --- bf16 weights + bf16 output (v5e/v6e/v7x bandwidth path), f32 math ---
    prep_bf16 = prepare_params(params, Dr, Dl, compute_dtype=jnp.bfloat16)
    out_bf16 = jax.block_until_ready(
        custom_neural_network_forward(reactant, ligand, prep_bf16,
                                      out_dtype=jnp.bfloat16))
    assert out_bf16.shape == (B, Do)
    assert jnp.allclose(out_bf16.astype(jnp.float32), ref, rtol=1e-1, atol=0.0), \
        "bf16 mismatch"

    # --- exercise the batch grid / pipelining path (multiple row tiles) ---
    B2 = 24
    k_r2, k_l2 = jax.random.split(jax.random.PRNGKey(1), 2)
    reactant2 = jax.random.normal(k_r2, (B2, Dr), jnp.float32)
    ligand2 = jax.random.normal(k_l2, (B2, Dl), jnp.float32)
    out2 = jax.block_until_ready(
        custom_neural_network_forward(reactant2, ligand2, prep_f32, block_b=8))
    ref2 = reference_forward(reactant2, ligand2, params)
    assert out2.shape == (B2, Do)
    assert jnp.allclose(out2, ref2, rtol=2e-2, atol=0.0), "gridded mismatch"

    # --- trailing partial batch tile (B % tb != 0) ---
    B3 = 20
    reactant3 = reactant2[:B3]
    ligand3 = ligand2[:B3]
    out3 = jax.block_until_ready(
        custom_neural_network_forward(reactant3, ligand3, prep_f32, block_b=8))
    assert out3.shape == (B3, Do)
    assert jnp.allclose(out3, ref2[:B3], rtol=2e-2, atol=0.0), "partial-tile mismatch"

    print("KERNEL_OK")
</pallas_src>

<mosaic_0001>
module attributes {stable_mosaic.version = 11 : i64} {
  func.func @_fused_dnn_kernel(%arg0: i32, %arg1: memref<2x16xf32, #tpu.memory_space<vmem>>, %arg2: memref<2x16xf32, #tpu.memory_space<vmem>>, %arg3: memref<16x128xf32, #tpu.memory_space<vmem>>, %arg4: memref<16x128xf32, #tpu.memory_space<vmem>>, %arg5: memref<1x128xf32, #tpu.memory_space<vmem>>, %arg6: memref<128x48xf32, #tpu.memory_space<vmem>>, %arg7: memref<1x48xf32, #tpu.memory_space<vmem>>, %arg8: memref<2x48xf32, #tpu.memory_space<vmem>>) attributes {dimension_semantics = [#tpu.dimension_semantics<parallel>], iteration_bounds = array<i64: 1>, scalar_prefetch = 0 : i64, scratch_operands = 0 : i64, tpu.core_type = #tpu.core_type<tc>, window_params = [{transform_indices = @transform_0, window_bounds = array<i64: 2, 16>}, {transform_indices = @transform_1, window_bounds = array<i64: 2, 16>}, {pipeline_mode = #tpu.pipeline_mode<synchronous>, transform_indices = @transform_2, window_bounds = array<i64: 16, 128>}, {pipeline_mode = #tpu.pipeline_mode<synchronous>, transform_indices = @transform_3, window_bounds = array<i64: 16, 128>}, {pipeline_mode = #tpu.pipeline_mode<synchronous>, transform_indices = @transform_4, window_bounds = array<i64: 1, 128>}, {pipeline_mode = #tpu.pipeline_mode<synchronous>, transform_indices = @transform_5, window_bounds = array<i64: 128, 48>}, {pipeline_mode = #tpu.pipeline_mode<synchronous>, transform_indices = @transform_6, window_bounds = array<i64: 1, 48>}, {transform_indices = @transform_7, window_bounds = array<i64: 2, 48>}]} {
    %c0 = arith.constant 0 : index
    %c0_0 = arith.constant 0 : index
    %0 = vector.load %arg1[%c0, %c0_0] : memref<2x16xf32, #tpu.memory_space<vmem>>, vector<2x16xf32>
    %c0_1 = arith.constant 0 : index
    %c0_2 = arith.constant 0 : index
    %1 = vector.load %arg2[%c0_1, %c0_2] : memref<2x16xf32, #tpu.memory_space<vmem>>, vector<2x16xf32>
    %c0_3 = arith.constant 0 : index
    %c0_4 = arith.constant 0 : index
    %2 = vector.load %arg3[%c0_3, %c0_4] : memref<16x128xf32, #tpu.memory_space<vmem>>, vector<16x128xf32>
    %cst = arith.constant dense<0.000000e+00> : vector<2x128xf32>
    %3 = tpu.matmul %0, %2, %cst {dimension_numbers = #tpu.dot_dimension_numbers<[1], [0], [0], [1], [0, 0, 1, 1], [], []>} : vector<2x16xf32>, vector<16x128xf32>, vector<2x128xf32> -> vector<2x128xf32>
    %c0_5 = arith.constant 0 : index
    %c0_6 = arith.constant 0 : index
    %4 = vector.load %arg4[%c0_5, %c0_6] : memref<16x128xf32, #tpu.memory_space<vmem>>, vector<16x128xf32>
    %cst_7 = arith.constant dense<0.000000e+00> : vector<2x128xf32>
    %5 = tpu.matmul %1, %4, %cst_7 {dimension_numbers = #tpu.dot_dimension_numbers<[1], [0], [0], [1], [0, 0, 1, 1], [], []>} : vector<2x16xf32>, vector<16x128xf32>, vector<2x128xf32> -> vector<2x128xf32>
    %6 = arith.addf %3, %5 : vector<2x128xf32>
    %c0_8 = arith.constant 0 : index
    %c0_9 = arith.constant 0 : index
    %7 = vector.load %arg5[%c0_8, %c0_9] : memref<1x128xf32, #tpu.memory_space<vmem>>, vector<1x128xf32>
    %8 = vector.broadcast %7 : vector<1x128xf32> to vector<2x128xf32>
    %9 = arith.addf %6, %8 : vector<2x128xf32>
    %cst_10 = arith.constant 0.000000e+00 : f32
    %10 = vector.broadcast %cst_10 : f32 to vector<2x128xf32>
    %11 = arith.cmpf ogt, %9, %10 : vector<2x128xf32>
    %cst_11 = arith.constant 0.00999999977 : f32
    %12 = vector.broadcast %cst_11 : f32 to vector<2x128xf32>
    %13 = arith.mulf %12, %9 : vector<2x128xf32>
    %14 = arith.select %11, %9, %13 : vector<2x128xi1>, vector<2x128xf32>
    %c0_12 = arith.constant 0 : index
    %c0_13 = arith.constant 0 : index
    %15 = vector.load %arg6[%c0_12, %c0_13] : memref<128x48xf32, #tpu.memory_space<vmem>>, vector<128x48xf32>
    %cst_14 = arith.constant dense<0.000000e+00> : vector<2x48xf32>
    %16 = tpu.matmul %14, %15, %cst_14 {dimension_numbers = #tpu.dot_dimension_numbers<[1], [0], [0], [1], [0, 0, 1, 1], [], []>} : vector<2x128xf32>, vector<128x48xf32>, vector<2x48xf32> -> vector<2x48xf32>
    %c0_15 = arith.constant 0 : index
    %c0_16 = arith.constant 0 : index
    %17 = vector.load %arg7[%c0_15, %c0_16] : memref<1x48xf32, #tpu.memory_space<vmem>>, vector<1x48xf32>
    %18 = vector.broadcast %17 : vector<1x48xf32> to vector<2x48xf32>
    %19 = arith.addf %16, %18 : vector<2x48xf32>
    %cst_17 = arith.constant 0.000000e+00 : f32
    %20 = vector.broadcast %cst_17 : f32 to vector<2x48xf32>
    %21 = arith.cmpf ogt, %19, %20 : vector<2x48xf32>
    %cst_18 = arith.constant 0.00999999977 : f32
    %22 = vector.broadcast %cst_18 : f32 to vector<2x48xf32>
    %23 = arith.mulf %22, %19 : vector<2x48xf32>
    %24 = arith.select %21, %19, %23 : vector<2x48xi1>, vector<2x48xf32>
    %cst_19 = arith.constant 0.000000e+00 : f32
    %25 = vector.broadcast %cst_19 : f32 to vector<2x48xf32>
    %26 = arith.subf %25, %24 : vector<2x48xf32>
    %cst_20 = arith.constant 1.42631662 : f32
    %27 = vector.broadcast %cst_20 : f32 to vector<2x48xf32>
    %28 = arith.mulf %26, %27 : vector<2x48xf32>
    %29 = math.exp %28 : vector<2x48xf32>
    %cst_21 = arith.constant 2.04314627E+12 : f32
    %30 = vector.broadcast %cst_21 : f32 to vector<2x48xf32>
    %31 = arith.mulf %30, %29 : vector<2x48xf32>
    %c0_22 = arith.constant 0 : index
    %c0_23 = arith.constant 0 : index
    %32 = vector.load %arg8[%c0_22, %c0_23] : memref<2x48xf32, #tpu.memory_space<vmem>>, vector<2x48xf32>
    tpu.vector_store %arg8[%c0_22, %c0_23], %31 {strides = array<i32>} : memref<2x48xf32, #tpu.memory_space<vmem>>, vector<2x48xf32>,
    return
  }
  func.func @transform_0(%arg0: i32) -> (i32, i32) {
    %c0_i32 = arith.constant 0 : i32
    %c0_i32_0 = arith.constant 0 : i32
    return %arg0, %c0_i32 : i32, i32
  }
  func.func @transform_1(%arg0: i32) -> (i32, i32) {
    %c0_i32 = arith.constant 0 : i32
    %c0_i32_0 = arith.constant 0 : i32
    return %arg0, %c0_i32 : i32, i32
  }
  func.func @transform_2(%arg0: i32) -> (i32, i32) {
    %c0_i32 = arith.constant 0 : i32
    %c0_i32_0 = arith.constant 0 : i32
    %c0_i32_1 = arith.constant 0 : i32
    return %c0_i32, %c0_i32_0 : i32, i32
  }
  func.func @transform_3(%arg0: i32) -> (i32, i32) {
    %c0_i32 = arith.constant 0 : i32
    %c0_i32_0 = arith.constant 0 : i32
    %c0_i32_1 = arith.constant 0 : i32
    return %c0_i32, %c0_i32_0 : i32, i32
  }
  func.func @transform_4(%arg0: i32) -> (i32, i32) {
    %c0_i32 = arith.constant 0 : i32
    %c0_i32_0 = arith.constant 0 : i32
    %c0_i32_1 = arith.constant 0 : i32
    return %c0_i32, %c0_i32_0 : i32, i32
  }
  func.func @transform_5(%arg0: i32) -> (i32, i32) {
    %c0_i32 = arith.constant 0 : i32
    %c0_i32_0 = arith.constant 0 : i32
    %c0_i32_1 = arith.constant 0 : i32
    return %c0_i32, %c0_i32_0 : i32, i32
  }
  func.func @transform_6(%arg0: i32) -> (i32, i32) {
    %c0_i32 = arith.constant 0 : i32
    %c0_i32_0 = arith.constant 0 : i32
    %c0_i32_1 = arith.constant 0 : i32
    return %c0_i32, %c0_i32_0 : i32, i32
  }
  func.func @transform_7(%arg0: i32) -> (i32, i32) {
    %c0_i32 = arith.constant 0 : i32
    %c0_i32_0 = arith.constant 0 : i32
    return %arg0, %c0_i32 : i32, i32
  }
}

</mosaic_0001>

<bundles_post_ra>
// kernel: custom_neural_network_forward.1
= control target key start
LH: loop header
LB: loop body
LE: loop exit
PB: predicated region body
PF: predicated region fallthrough
CT: control target
= control target key end

     0   :  { %vm33_vm0 = vcmask 130048   ;;  %s303_s0 = inlined_call_operand.vmem [shape: f32[2,16], index: 0, kind: input, shape index: {}]   ;;  %s304_s1 = inlined_call_operand.vmem [shape: f32[2,16], index: 1, kind: input, shape index: {}]   ;;  %s305_s2 = inlined_call_operand.vmem [shape: f32[16,128], index: 2, kind: input, shape index: {}]   ;;  %s306_s3 = inlined_call_operand.vmem [shape: f32[16,128], index: 3, kind: input, shape index: {}]   ;;  %s307_s4 = inlined_call_operand.vmem [shape: f32[1,128], index: 4, kind: input, shape index: {}]   ;;  %s308_s5 = inlined_call_operand.vmem [shape: f32[128,48], index: 5, kind: input, shape index: {}]   ;;  %s309_s6 = inlined_call_operand.vmem [shape: f32[1,48], index: 6, kind: input, shape index: {}]   ;;  %s310_s7 = inlined_call_operand.hbm [shape: f32[2,48], index: 7, kind: output, shape index: {}]  }
   0x1   :  { %v32_v0 = vld [vmem:[%s306_s3 + $0x8] sm:$0xff]  ;;  %v31_v2 = vld [vmem:[%s306_s3] sm:$0xff]  ;;  %v103_v6 = vld [vmem:[%s308_s5 + $0x78] sm:$0xff] }
   0x2   :  { %v30_v1 = vld [vmem:[%s305_s2 + $0x8] sm:$0xff]  ;;  %51 = vmatpush.msra.mxu0 %v32_v0  ;;  %v29_v3 = vld [vmem:[%s305_s2] sm:$0xff]  ;;  %v102_v7 = vld [vmem:[%s308_s5 + $0x70] sm:$0xff]  ;;  %108 = vmatpush.msra.mxu2 %v103_v6 }
   0x3   :  { %74 = vmatpush.msra.mxu1 %v30_v1  ;;  %v28_v4 = vld [vmem:[%s304_s1] sm:$0x3]  ;;  %v101_v8 = vld [vmem:[%s308_s5 + $0x68] sm:$0xff] }
   0x4   :  { %v27_v5 = vld [vmem:[%s303_s0] sm:$0x3]  ;;  %52 = vmatpush.msra.mxu0 %v31_v2 }
   0x5   :  { %75 = vmatpush.msra.mxu1 %v29_v3  ;;  %154 = vmatmul.msk.f32.vlgmr.msra.gmra.mxu0 %vm33_vm0, %v28_v4 }
   0x6   :  { %155 = vmatmul.msk.f32.vlgmr.msra.gmra.mxu1 %vm33_vm0, %v27_v5 }
   0x7   :  { %12 = vsyncpa [#allocation3], 0  ;;  %109 = vmatpush.msra.mxu2 %v102_v7  ;;  %v100_v9 = vld [vmem:[%s308_s5 + $0x60] sm:$0xff]  ;;  %v99_v10 = vld [vmem:[%s308_s5 + $0x58] sm:$0xff]  ;;  %s145_s20 = sshll.u32 %s310_s7, 4  ;;  %vm136_vm3 = vcmask 386048   ;;  %s146_s20 = int_to_ptr.hbm [resolvable:$true] %s145_s20 }
   0x8   :  { %v98_v11 = vld [vmem:[%s308_s5 + $0x50] sm:$0xff]  ;;  %v97_v12 = vld [vmem:[%s308_s5 + $0x48] sm:$0xff]  ;;  %v96_v13 = vld [vmem:[%s308_s5 + $0x40] sm:$0xff] }
   0x9   :  { %110 = vmatpush.msra.mxu2 %v101_v8  ;;  %v95_v14 = vld [vmem:[%s308_s5 + $0x38] sm:$0xff]  ;;  %v94_v15 = vld [vmem:[%s308_s5 + $0x30] sm:$0xff]  ;;  %v93_v16 = vld [vmem:[%s308_s5 + $0x28] sm:$0xff] }
   0xa   :  { %v92_v17 = vld [vmem:[%s308_s5 + $0x20] sm:$0xff]  ;;  %v91_v18 = vld [vmem:[%s308_s5 + $0x18] sm:$0xff]  ;;  %v90_v19 = vld [vmem:[%s308_s5 + $0x10] sm:$0xff] }
   0xb   :  { %111 = vmatpush.msra.mxu2 %v100_v9  ;;  %v89_v20 = vld [vmem:[%s308_s5 + $0x8] sm:$0xff]  ;;  %v88_v21 = vld [vmem:[%s308_s5] sm:$0xff] }
   0xc   :  { %v157_v22 = vld [vmem:[%s307_s4] ss:$0 sm:$0xff]  ;;  %s187_s4 = smov [#allocation2]  }
   0xd   :  { %112 = vmatpush.msra.mxu2 %v99_v10  ;;  %v158_v29 = vld [vmem:[%s309_s6] ss:$0 sm:$0xff]  ;;  %s143_s5 = sshll.u32 %s187_s4, 4  ;;  %s144_s5 = int_to_ptr.vmem [resolvable:$true] %s143_s5 }
   0xf   :  { %113 = vmatpush.msra.mxu2 %v98_v11 }
  0x11   :  { %114 = vmatpush.msra.mxu2 %v97_v12 }
  0x13   :  { %115 = vmatpush.msra.mxu2 %v96_v13 }
  0x15   :  { %116 = vmatpush.msra.mxu2 %v95_v14 }
  0x17   :  { %117 = vmatpush.msra.mxu2 %v94_v15 }
  0x19   :  { %118 = vmatpush.msra.mxu2 %v93_v16 }
  0x1b   :  { %119 = vmatpush.msra.mxu2 %v92_v17 }
  0x1d   :  { %120 = vmatpush.msra.mxu2 %v91_v18 }
  0x1f   :  { %121 = vmatpush.msra.mxu2 %v90_v19 }
  0x21   :  { %122 = vmatpush.msra.mxu2 %v89_v20 }
  0x23   :  { %123 = vmatpush.msra.mxu2 %v88_v21 }
  0x82   :  { %v54_v23 = vpop.f32.mrf.mxu0 }
  0x83   :  { %v77_v24 = vpop.f32.mrf.mxu1 }
  0x84   :  { %v78_v25 = vadd.f32 %v77_v24, %v54_v23 }
  0x86   :  { %v84_v26 = vadd.f32 %v157_v22, %v78_v25 }
  0x88   :  { %vm85_vm1 = vcmp.gt.f32.partialorder %v84_v26, 0.0  ;;  %v86_v27 = vmul.f32 0.01, %v84_v26 }
  0x8a   :  { %v87_v28 = vsel %vm85_vm1, %v84_v26, %v86_v27 }
  0x8b   :  { %124 = vmatmul.f32.vlgmr.msra.gmra.mxu2 %v87_v28 }
 0x10e   :  { %v125_v30 = vpop.f32.mrf.mxu2 }
 0x10f   :  { %v126_v31 = vadd.f32 %v158_v29, %v125_v30 }
 0x111   :  { %vm128_vm2 = vcmp.gt.f32.partialorder %v126_v31, 0.0  ;;  %v129_v32 = vmul.f32 0.01, %v126_v31 }
 0x113   :  { %v130_v33 = vsel %vm128_vm2, %v126_v31, %v129_v32 }
 0x114   :  { %v131_v34 = vsub.f32 0.0, %v130_v33 }
 0x116   :  { %v132_v35 = vmul.f32 1.4263166, %v131_v34 }
 0x118   :  { %v133_v36 = vmul.f32 1.442695, %v132_v35 }
 0x11a   :  { %159 = vpow2.f32 %v133_v36 }
 0x120   :  { %v160_v37 = vpop.eup %159 }
 0x121   :  { %v135_v38 = vmul.f32 2.0431463e+12, %v160_v37 }
 0x123   :  { %137 = vst.msk [vmem:[#allocation2] sm:$0x3] %vm136_vm3, %v135_v38 }
 0x124   :  { %148 = dma.vmem_to_hbm [thread:$0]  %s144_s5, 32, %s146_s20, [#allocation3]  }
 0x125   :  { %185 = dma.done.wait [#allocation3], 32  }
 0x126   :  { %186 = vsyncadd [#allocation3], 4294967264 }
 0x127   :  { %153 = vsyncpa [#allocation3], 1 }

</bundles_post_ra>
